<compile_context>
chip_gen: v7x
topology: tpu7x:2x2x1
jax: 0.10.0
libtpu: 0.0.40
codegen_flags: <defaults>
</compile_context>

<pallas_src>
import functools

import jax
import jax.numpy as jnp
from jax import lax
from jax.experimental import pallas as pl
from jax.experimental.pallas import tpu as pltpu

_LANES = 128
_MAX_ROW_TILE = 2048          # rows per spatial tile (f32 state block = 1 MiB)
_MAX_TIME_BLOCK = 8           # simulation steps folded into one grid step
_SMALL_PROBLEM_BYTES = 1 << 20


def _round_up(x, m):
    return -(-x // m) * m


def _input_node_steps_kernel(x_ref, trace_in_ref, summed_in_ref,
                             trace_out_ref, summed_out_ref,
                             *, decay: float, scale: float,
                             traces_additive: bool, time_block: int,
                             num_steps: int):
    """One (spatial tile, time block) grid step.

    Grid = (spatial_tiles, ceil(T / time_block)); time axis is "arbitrary".
    x_ref                        : (time_block, row_tile, 128) spikes (narrow dtype)
    trace_in_ref / summed_in_ref : (row_tile, 128) f32 initial state (read at t==0)
    trace_out_ref/summed_out_ref : resident f32 accumulators across the time axis.
    """
    tb = pl.program_id(1)

    @pl.when(tb == 0)
    def _():
        trace_out_ref[...] = trace_in_ref[...]
        summed_out_ref[...] = summed_in_ref[...]

    needs_guard = (num_steps % time_block) != 0

    def body(t_sub, carry):
        tr, sm = carry
        x = x_ref[t_sub].astype(jnp.float32)          # s = x (0/1 spikes)
        tr_new = tr * decay                           # trace *= trace_decay
        if traces_additive:
            tr_new = tr_new + scale * x               # trace += trace_scale * s
        else:
            tr_new = jnp.where(x != 0, scale, tr_new) # masked_fill_(s.bool(), ...)
        sm_new = sm + x                               # summed += x
        if needs_guard:                               # zero-padded trailing steps
            valid = (tb * time_block + t_sub) < num_steps
            tr_new = jnp.where(valid, tr_new, tr)
            sm_new = jnp.where(valid, sm_new, sm)
        return tr_new, sm_new

    tr, sm = lax.fori_loop(0, time_block, body,
                           (trace_out_ref[...], summed_out_ref[...]),
                           unroll=True)
    trace_out_ref[...] = tr
    summed_out_ref[...] = sm


def _pure_jax_steps(x_seq, trace, summed, trace_decay, trace_scale,
                    traces_additive):
    """Fused XLA fallback for tiny problems (pallas launch overhead dominates)."""
    decay = jnp.float32(trace_decay)
    scale = jnp.float32(trace_scale)

    def step(carry, x):
        tr, sm = carry
        xf = x.astype(jnp.float32)
        tr = tr * decay
        if traces_additive:
            tr = tr + scale * xf
        else:
            tr = jnp.where(xf != 0, scale, tr)
        return (tr, sm + xf), None

    (tr, sm), _ = lax.scan(
        step, (trace.astype(jnp.float32), summed.astype(jnp.float32)), x_seq)
    return x_seq[-1], tr.astype(trace.dtype), sm.astype(summed.dtype)


def input_node_forward_steps(x_seq, trace, summed, trace_decay, trace_scale,
                             *, traces_additive: bool = False,
                             use_pallas=None):
    """Run T fused simulation steps of the Input node.

    x_seq          : (T, B, *shape) spike inputs (bf16 / int8 / f32), one per step.
    trace, summed  : (B, *shape) state tensors.
    Returns (s, trace, summed) after the last step (s == x_seq[-1]).
    """
    T = int(x_seq.shape[0])
    if T == 0:
        raise ValueError("need at least one simulation step")

    if x_seq.dtype == jnp.bool_:          # bool blocks are awkward on TPU; widen
        x_seq = x_seq.astype(jnp.int8)

    state_shape = trace.shape
    state_dtype_tr = trace.dtype
    state_dtype_sm = summed.dtype
    L = int(trace.size)
    x_itemsize = jnp.dtype(x_seq.dtype).itemsize

    if use_pallas is None:
        use_pallas = T * L * x_itemsize >= _SMALL_PROBLEM_BYTES
    if not use_pallas:
        return _pure_jax_steps(x_seq, trace, summed, trace_decay, trace_scale,
                               traces_additive)

    # ---- layout: lane/sublane-dense (rows, 128) ------------------------------
    # Row alignment from the narrowest dtype in play: 8 rows for 4-byte,
    # 16 for 2-byte, 32 for 1-byte spike dtypes.
    align = max(8, 32 // max(x_itemsize, 1))
    rows = -(-L // _LANES)
    rows_a = _round_up(rows, align)

    # Spatial tiling: fit the VMEM budget; when possible, give v7x's second
    # TensorCore its own tile(s) on the "parallel" axis.
    max_rt = max(align, (_MAX_ROW_TILE // align) * align)
    n_tiles = -(-rows_a // max_rt)
    if n_tiles == 1 and rows_a >= 2 * align:
        n_tiles = 2
    row_tile = _round_up(-(-rows_a // n_tiles), align)
    rows_p = n_tiles * row_tile
    Lp = rows_p * _LANES

    # Time blocking.
    time_block = min(T, _MAX_TIME_BLOCK)
    n_tblocks = -(-T // time_block)
    T_p = n_tblocks * time_block

    # ---- operands (spikes keep their narrow HBM dtype) -----------------------
    xf = x_seq.reshape(T, L)
    if Lp != L or T_p != T:               # only a few alignment rows / steps
        xf = jnp.pad(xf, ((0, T_p - T), (0, Lp - L)))
    x3 = xf.reshape(T_p, rows_p, _LANES)

    tf = trace.reshape(L).astype(jnp.float32)
    sf = summed.reshape(L).astype(jnp.float32)
    if Lp != L:
        tf = jnp.pad(tf, (0, Lp - L))
        sf = jnp.pad(sf, (0, Lp - L))
    t2 = tf.reshape(rows_p, _LANES)
    s2 = sf.reshape(rows_p, _LANES)

    kernel = functools.partial(
        _input_node_steps_kernel,
        decay=float(trace_decay), scale=float(trace_scale),
        traces_additive=bool(traces_additive),
        time_block=time_block, num_steps=T)

    state_spec = pl.BlockSpec((row_tile, _LANES), lambda i, t: (i, 0))

    # Buffered-footprint estimate: x double-buffered, state in double-buffered,
    # state out resident.
    x_block_bytes = time_block * row_tile * _LANES * x_itemsize
    state_block_bytes = row_tile * _LANES * 4
    footprint = 2 * x_block_bytes + 6 * state_block_bytes
    vmem_limit = int(min(48 * 2**20, max(24 * 2**20, 2 * footprint)))

    trace_new, summed_new = pl.pallas_call(
        kernel,
        out_shape=(
            jax.ShapeDtypeStruct((rows_p, _LANES), jnp.float32),
            jax.ShapeDtypeStruct((rows_p, _LANES), jnp.float32),
        ),
        grid_spec=pltpu.PrefetchScalarGridSpec(
            num_scalar_prefetch=0,
            grid=(n_tiles, n_tblocks),
            in_specs=[
                pl.BlockSpec((time_block, row_tile, _LANES),
                             lambda i, t: (t, i, 0)),
                state_spec,   # trace  (consumed only at time-block 0)
                state_spec,   # summed (consumed only at time-block 0)
            ],
            out_specs=(state_spec, state_spec),
        ),
        input_output_aliases={1: 0, 2: 1},   # in-place trace / summed update
        compiler_params=pltpu.CompilerParams(
            dimension_semantics=("parallel", "arbitrary"),
            vmem_limit_bytes=vmem_limit),
    )(x3, t2, s2)

    trace_out = (trace_new.reshape(Lp)[:L].reshape(state_shape)
                 .astype(state_dtype_tr))
    summed_out = (summed_new.reshape(Lp)[:L].reshape(state_shape)
                  .astype(state_dtype_sm))
    s_out = x_seq[-1]          # spikes after the last step equal the last input
    return s_out, trace_out, summed_out


def input_node_forward(x, trace, summed, trace_decay, trace_scale,
                       *, traces_additive: bool = False, use_pallas=None):
    """Single simulation step (the module's `forward`)."""
    return input_node_forward_steps(
        x[None], trace, summed, trace_decay, trace_scale,
        traces_additive=traces_additive, use_pallas=use_pallas)


# TODO(synk): reset_state_variables / set_batch_size / train-mode toggles are
# host-side buffer management in the PyTorch module; no kernel equivalent needed.


def _reference_step(x, trace, summed, trace_decay, trace_scale, traces_additive):
    xf = x.astype(jnp.float32)
    s = x
    tr = trace * trace_decay
    if traces_additive:
        tr = tr + trace_scale * xf
    else:
        tr = jnp.where(xf != 0, trace_scale, tr)
    return s, tr, summed + xf


if __name__ == "__main__":
    dt = 1.0
    tc_trace = 20.0
    trace_scale = 1.0
    trace_decay = float(jnp.exp(jnp.float32(-dt / tc_trace)))   # compute_decays

    key = jax.random.PRNGKey(0)

    configs = [
        # (batch, shape, T, force_pallas)
        (2, (4, 16, 16), 8, True),    # small module-sized config, force kernel
        (16, (8, 32, 32), 16, None),  # larger config, auto-selects the kernel
    ]

    for (B, shape, T, force) in configs:
        key, k_spk, k_tr, k_sum = jax.random.split(key, 4)
        # Spikes stay narrow (bf16) in HBM; 0/1 values are exact in bf16.
        x_seq = jax.random.bernoulli(
            k_spk, p=0.3, shape=(T, B) + shape).astype(jnp.bfloat16)
        trace0 = jax.random.uniform(k_tr, (B,) + shape, dtype=jnp.float32)
        summed0 = jax.random.uniform(k_sum, (B,) + shape, dtype=jnp.float32)

        for additive in (False, True):
            # Fused multi-step kernel.
            s_new, trace_new, summed_new = input_node_forward_steps(
                x_seq, trace0, summed0, trace_decay, trace_scale,
                traces_additive=additive, use_pallas=force)
            jax.block_until_ready((s_new, trace_new, summed_new))

            # Pure-JAX reference: T sequential forward steps.
            s_ref, tr_ref, sum_ref = None, trace0, summed0
            for t in range(T):
                s_ref, tr_ref, sum_ref = _reference_step(
                    x_seq[t], tr_ref, sum_ref, trace_decay, trace_scale,
                    additive)

            assert jnp.allclose(s_new.astype(jnp.float32),
                                s_ref.astype(jnp.float32))
            assert jnp.allclose(trace_new, tr_ref, atol=1e-5)
            assert jnp.allclose(summed_new, sum_ref, atol=1e-4)

        # Single-step path (the module's forward), forced through the kernel.
        s1, tr1, sm1 = input_node_forward(
            x_seq[0], trace0, summed0, trace_decay, trace_scale,
            traces_additive=False, use_pallas=True)
        s1_ref, tr1_ref, sm1_ref = _reference_step(
            x_seq[0], trace0, summed0, trace_decay, trace_scale, False)
        jax.block_until_ready((s1, tr1, sm1))

        assert jnp.allclose(s1.astype(jnp.float32), s1_ref.astype(jnp.float32))
        assert jnp.allclose(tr1, tr1_ref, atol=1e-6)
        assert jnp.allclose(sm1, sm1_ref, atol=1e-6)

    print("KERNEL_OK")
</pallas_src>

<mosaic_0001>
module attributes {stable_mosaic.version = 11 : i64} {
  func.func @_input_node_steps_kernel(%arg0: i32, %arg1: i32, %arg2: memref<8x16x128xbf16, #tpu.memory_space<vmem>>, %arg3: memref<16x128xf32, #tpu.memory_space<vmem>>, %arg4: memref<16x128xf32, #tpu.memory_space<vmem>>, %arg5: memref<16x128xf32, #tpu.memory_space<vmem>>, %arg6: memref<16x128xf32, #tpu.memory_space<vmem>>) attributes {dimension_semantics = [#tpu.dimension_semantics<parallel>, #tpu.dimension_semantics<arbitrary>], iteration_bounds = array<i64: 1, 1>, scalar_prefetch = 0 : i64, scratch_operands = 0 : i64, tpu.core_type = #tpu.core_type<tc>, window_params = [{transform_indices = @transform_0, window_bounds = array<i64: 8, 16, 128>}, {transform_indices = @transform_1, window_bounds = array<i64: 16, 128>}, {transform_indices = @transform_2, window_bounds = array<i64: 16, 128>}, {transform_indices = @transform_3, window_bounds = array<i64: 16, 128>}, {transform_indices = @transform_4, window_bounds = array<i64: 16, 128>}]} {
    %c0_i32 = arith.constant 0 : i32
    %0 = arith.cmpi eq, %arg1, %c0_i32 : i32
    %1 = arith.extui %0 : i1 to i32
    %c0_i32_0 = arith.constant 0 : i32
    %2 = arith.cmpi ne, %1, %c0_i32_0 : i32
    scf.if %2 {
      %c0_48 = arith.constant 0 : index
      %c0_49 = arith.constant 0 : index
      %95 = vector.load %arg3[%c0_48, %c0_49] : memref<16x128xf32, #tpu.memory_space<vmem>>, vector<16x128xf32>
      %c0_50 = arith.constant 0 : index
      %c0_51 = arith.constant 0 : index
      %96 = vector.load %arg5[%c0_50, %c0_51] : memref<16x128xf32, #tpu.memory_space<vmem>>, vector<16x128xf32>
      tpu.vector_store %arg5[%c0_50, %c0_51], %95 {strides = array<i32>} : memref<16x128xf32, #tpu.memory_space<vmem>>, vector<16x128xf32>,
      %c0_52 = arith.constant 0 : index
      %c0_53 = arith.constant 0 : index
      %97 = vector.load %arg4[%c0_52, %c0_53] : memref<16x128xf32, #tpu.memory_space<vmem>>, vector<16x128xf32>
      %c0_54 = arith.constant 0 : index
      %c0_55 = arith.constant 0 : index
      %98 = vector.load %arg6[%c0_54, %c0_55] : memref<16x128xf32, #tpu.memory_space<vmem>>, vector<16x128xf32>
      tpu.vector_store %arg6[%c0_54, %c0_55], %97 {strides = array<i32>} : memref<16x128xf32, #tpu.memory_space<vmem>>, vector<16x128xf32>,
    } else {
    }
    %c0 = arith.constant 0 : index
    %c0_1 = arith.constant 0 : index
    %3 = vector.load %arg5[%c0, %c0_1] : memref<16x128xf32, #tpu.memory_space<vmem>>, vector<16x128xf32>
    %c0_2 = arith.constant 0 : index
    %c0_3 = arith.constant 0 : index
    %4 = vector.load %arg6[%c0_2, %c0_3] : memref<16x128xf32, #tpu.memory_space<vmem>>, vector<16x128xf32>
    %c0_i32_4 = arith.constant 0 : i32
    %5 = arith.index_cast %c0_i32_4 : i32 to index
    %c0_5 = arith.constant 0 : index
    %c0_6 = arith.constant 0 : index
    %6 = vector.load %arg2[%5, %c0_5, %c0_6] : memref<8x16x128xbf16, #tpu.memory_space<vmem>>, vector<1x16x128xbf16>
    %7 = vector.shape_cast %6 : vector<1x16x128xbf16> to vector<16x128xbf16>
    %8 = arith.extf %7 : vector<16x128xbf16> to vector<16x128xf32>
    %cst = arith.constant 0.951229453 : f32
    %9 = vector.broadcast %cst : f32 to vector<16x128xf32>
    %10 = arith.mulf %3, %9 : vector<16x128xf32>
    %cst_7 = arith.constant 0.000000e+00 : f32
    %11 = vector.broadcast %cst_7 : f32 to vector<16x128xf32>
    %12 = arith.cmpf one, %8, %11 : vector<16x128xf32>
    %cst_8 = arith.constant 1.000000e+00 : f32
    %13 = vector.broadcast %cst_8 : f32 to vector<16x128xf32>
    %14 = arith.select %12, %13, %10 : vector<16x128xi1>, vector<16x128xf32>
    %15 = arith.addf %4, %8 : vector<16x128xf32>
    %c1_i32 = arith.constant 1 : i32
    %16 = arith.index_cast %c1_i32 : i32 to index
    %c0_9 = arith.constant 0 : index
    %c0_10 = arith.constant 0 : index
    %17 = vector.load %arg2[%16, %c0_9, %c0_10] : memref<8x16x128xbf16, #tpu.memory_space<vmem>>, vector<1x16x128xbf16>
    %18 = vector.shape_cast %17 : vector<1x16x128xbf16> to vector<16x128xbf16>
    %19 = arith.extf %18 : vector<16x128xbf16> to vector<16x128xf32>
    %cst_11 = arith.constant 0.951229453 : f32
    %20 = vector.broadcast %cst_11 : f32 to vector<16x128xf32>
    %21 = arith.mulf %14, %20 : vector<16x128xf32>
    %cst_12 = arith.constant 0.000000e+00 : f32
    %22 = vector.broadcast %cst_12 : f32 to vector<16x128xf32>
    %23 = arith.cmpf one, %19, %22 : vector<16x128xf32>
    %cst_13 = arith.constant 1.000000e+00 : f32
    %24 = vector.broadcast %cst_13 : f32 to vector<16x128xf32>
    %25 = arith.select %23, %24, %21 : vector<16x128xi1>, vector<16x128xf32>
    %26 = arith.addf %15, %19 : vector<16x128xf32>
    %c2_i32 = arith.constant 2 : i32
    %27 = arith.index_cast %c2_i32 : i32 to index
    %c0_14 = arith.constant 0 : index
    %c0_15 = arith.constant 0 : index
    %28 = vector.load %arg2[%27, %c0_14, %c0_15] : memref<8x16x128xbf16, #tpu.memory_space<vmem>>, vector<1x16x128xbf16>
    %29 = vector.shape_cast %28 : vector<1x16x128xbf16> to vector<16x128xbf16>
    %30 = arith.extf %29 : vector<16x128xbf16> to vector<16x128xf32>
    %cst_16 = arith.constant 0.951229453 : f32
    %31 = vector.broadcast %cst_16 : f32 to vector<16x128xf32>
    %32 = arith.mulf %25, %31 : vector<16x128xf32>
    %cst_17 = arith.constant 0.000000e+00 : f32
    %33 = vector.broadcast %cst_17 : f32 to vector<16x128xf32>
    %34 = arith.cmpf one, %30, %33 : vector<16x128xf32>
    %cst_18 = arith.constant 1.000000e+00 : f32
    %35 = vector.broadcast %cst_18 : f32 to vector<16x128xf32>
    %36 = arith.select %34, %35, %32 : vector<16x128xi1>, vector<16x128xf32>
    %37 = arith.addf %26, %30 : vector<16x128xf32>
    %c3_i32 = arith.constant 3 : i32
    %38 = arith.index_cast %c3_i32 : i32 to index
    %c0_19 = arith.constant 0 : index
    %c0_20 = arith.constant 0 : index
    %39 = vector.load %arg2[%38, %c0_19, %c0_20] : memref<8x16x128xbf16, #tpu.memory_space<vmem>>, vector<1x16x128xbf16>
    %40 = vector.shape_cast %39 : vector<1x16x128xbf16> to vector<16x128xbf16>
    %41 = arith.extf %40 : vector<16x128xbf16> to vector<16x128xf32>
    %cst_21 = arith.constant 0.951229453 : f32
    %42 = vector.broadcast %cst_21 : f32 to vector<16x128xf32>
    %43 = arith.mulf %36, %42 : vector<16x128xf32>
    %cst_22 = arith.constant 0.000000e+00 : f32
    %44 = vector.broadcast %cst_22 : f32 to vector<16x128xf32>
    %45 = arith.cmpf one, %41, %44 : vector<16x128xf32>
    %cst_23 = arith.constant 1.000000e+00 : f32
    %46 = vector.broadcast %cst_23 : f32 to vector<16x128xf32>
    %47 = arith.select %45, %46, %43 : vector<16x128xi1>, vector<16x128xf32>
    %48 = arith.addf %37, %41 : vector<16x128xf32>
    %c4_i32 = arith.constant 4 : i32
    %49 = arith.index_cast %c4_i32 : i32 to index
    %c0_24 = arith.constant 0 : index
    %c0_25 = arith.constant 0 : index
    %50 = vector.load %arg2[%49, %c0_24, %c0_25] : memref<8x16x128xbf16, #tpu.memory_space<vmem>>, vector<1x16x128xbf16>
    %51 = vector.shape_cast %50 : vector<1x16x128xbf16> to vector<16x128xbf16>
    %52 = arith.extf %51 : vector<16x128xbf16> to vector<16x128xf32>
    %cst_26 = arith.constant 0.951229453 : f32
    %53 = vector.broadcast %cst_26 : f32 to vector<16x128xf32>
    %54 = arith.mulf %47, %53 : vector<16x128xf32>
    %cst_27 = arith.constant 0.000000e+00 : f32
    %55 = vector.broadcast %cst_27 : f32 to vector<16x128xf32>
    %56 = arith.cmpf one, %52, %55 : vector<16x128xf32>
    %cst_28 = arith.constant 1.000000e+00 : f32
    %57 = vector.broadcast %cst_28 : f32 to vector<16x128xf32>
    %58 = arith.select %56, %57, %54 : vector<16x128xi1>, vector<16x128xf32>
    %59 = arith.addf %48, %52 : vector<16x128xf32>
    %c5_i32 = arith.constant 5 : i32
    %60 = arith.index_cast %c5_i32 : i32 to index
    %c0_29 = arith.constant 0 : index
    %c0_30 = arith.constant 0 : index
    %61 = vector.load %arg2[%60, %c0_29, %c0_30] : memref<8x16x128xbf16, #tpu.memory_space<vmem>>, vector<1x16x128xbf16>
    %62 = vector.shape_cast %61 : vector<1x16x128xbf16> to vector<16x128xbf16>
    %63 = arith.extf %62 : vector<16x128xbf16> to vector<16x128xf32>
    %cst_31 = arith.constant 0.951229453 : f32
    %64 = vector.broadcast %cst_31 : f32 to vector<16x128xf32>
    %65 = arith.mulf %58, %64 : vector<16x128xf32>
    %cst_32 = arith.constant 0.000000e+00 : f32
    %66 = vector.broadcast %cst_32 : f32 to vector<16x128xf32>
    %67 = arith.cmpf one, %63, %66 : vector<16x128xf32>
    %cst_33 = arith.constant 1.000000e+00 : f32
    %68 = vector.broadcast %cst_33 : f32 to vector<16x128xf32>
    %69 = arith.select %67, %68, %65 : vector<16x128xi1>, vector<16x128xf32>
    %70 = arith.addf %59, %63 : vector<16x128xf32>
    %c6_i32 = arith.constant 6 : i32
    %71 = arith.index_cast %c6_i32 : i32 to index
    %c0_34 = arith.constant 0 : index
    %c0_35 = arith.constant 0 : index
    %72 = vector.load %arg2[%71, %c0_34, %c0_35] : memref<8x16x128xbf16, #tpu.memory_space<vmem>>, vector<1x16x128xbf16>
    %73 = vector.shape_cast %72 : vector<1x16x128xbf16> to vector<16x128xbf16>
    %74 = arith.extf %73 : vector<16x128xbf16> to vector<16x128xf32>
    %cst_36 = arith.constant 0.951229453 : f32
    %75 = vector.broadcast %cst_36 : f32 to vector<16x128xf32>
    %76 = arith.mulf %69, %75 : vector<16x128xf32>
    %cst_37 = arith.constant 0.000000e+00 : f32
    %77 = vector.broadcast %cst_37 : f32 to vector<16x128xf32>
    %78 = arith.cmpf one, %74, %77 : vector<16x128xf32>
    %cst_38 = arith.constant 1.000000e+00 : f32
    %79 = vector.broadcast %cst_38 : f32 to vector<16x128xf32>
    %80 = arith.select %78, %79, %76 : vector<16x128xi1>, vector<16x128xf32>
    %81 = arith.addf %70, %74 : vector<16x128xf32>
    %c7_i32 = arith.constant 7 : i32
    %82 = arith.index_cast %c7_i32 : i32 to index
    %c0_39 = arith.constant 0 : index
    %c0_40 = arith.constant 0 : index
    %83 = vector.load %arg2[%82, %c0_39, %c0_40] : memref<8x16x128xbf16, #tpu.memory_space<vmem>>, vector<1x16x128xbf16>
    %84 = vector.shape_cast %83 : vector<1x16x128xbf16> to vector<16x128xbf16>
    %85 = arith.extf %84 : vector<16x128xbf16> to vector<16x128xf32>
    %cst_41 = arith.constant 0.951229453 : f32
    %86 = vector.broadcast %cst_41 : f32 to vector<16x128xf32>
    %87 = arith.mulf %80, %86 : vector<16x128xf32>
    %cst_42 = arith.constant 0.000000e+00 : f32
    %88 = vector.broadcast %cst_42 : f32 to vector<16x128xf32>
    %89 = arith.cmpf one, %85, %88 : vector<16x128xf32>
    %cst_43 = arith.constant 1.000000e+00 : f32
    %90 = vector.broadcast %cst_43 : f32 to vector<16x128xf32>
    %91 = arith.select %89, %90, %87 : vector<16x128xi1>, vector<16x128xf32>
    %92 = arith.addf %81, %85 : vector<16x128xf32>
    %c8_i32 = arith.constant 8 : i32
    %c0_44 = arith.constant 0 : index
    %c0_45 = arith.constant 0 : index
    %93 = vector.load %arg5[%c0_44, %c0_45] : memref<16x128xf32, #tpu.memory_space<vmem>>, vector<16x128xf32>
    tpu.vector_store %arg5[%c0_44, %c0_45], %91 {strides = array<i32>} : memref<16x128xf32, #tpu.memory_space<vmem>>, vector<16x128xf32>,
    %c0_46 = arith.constant 0 : index
    %c0_47 = arith.constant 0 : index
    %94 = vector.load %arg6[%c0_46, %c0_47] : memref<16x128xf32, #tpu.memory_space<vmem>>, vector<16x128xf32>
    tpu.vector_store %arg6[%c0_46, %c0_47], %92 {strides = array<i32>} : memref<16x128xf32, #tpu.memory_space<vmem>>, vector<16x128xf32>,
    return
  }
  func.func @transform_0(%arg0: i32, %arg1: i32) -> (i32, i32, i32) {
    %c0_i32 = arith.constant 0 : i32
    %c0_i32_0 = arith.constant 0 : i32
    return %arg1, %arg0, %c0_i32 : i32, i32, i32
  }
  func.func @transform_1(%arg0: i32, %arg1: i32) -> (i32, i32) {
    %c0_i32 = arith.constant 0 : i32
    %c0_i32_0 = arith.constant 0 : i32
    return %arg0, %c0_i32 : i32, i32
  }
  func.func @transform_2(%arg0: i32, %arg1: i32) -> (i32, i32) {
    %c0_i32 = arith.constant 0 : i32
    %c0_i32_0 = arith.constant 0 : i32
    return %arg0, %c0_i32 : i32, i32
  }
  func.func @transform_3(%arg0: i32, %arg1: i32) -> (i32, i32) {
    %c0_i32 = arith.constant 0 : i32
    %c0_i32_0 = arith.constant 0 : i32
    return %arg0, %c0_i32 : i32, i32
  }
  func.func @transform_4(%arg0: i32, %arg1: i32) -> (i32, i32) {
    %c0_i32 = arith.constant 0 : i32
    %c0_i32_0 = arith.constant 0 : i32
    return %arg0, %c0_i32 : i32, i32
  }
}

</mosaic_0001>

<bundles_post_ra>
// kernel: tpu_custom_call.1
= control target key start
LH: loop header
LB: loop body
LE: loop exit
PB: predicated region body
PF: predicated region fallthrough
CT: control target
= control target key end

     0   :  { %10 = vsyncpa [#allocation3], 0  ;;  %s528_s0 = inlined_call_operand.vmem [shape: bf16[8,16,128], index: 0, kind: input, shape index: {}]   ;;  %s529_s1 = inlined_call_operand.hbm [shape: f32[16,128], index: 1, kind: input, shape index: {}, may-alias: {1,3}]   ;;  %s530_s2 = inlined_call_operand.hbm [shape: f32[16,128], index: 2, kind: input, shape index: {}, may-alias: {2,4}]   ;;  %s531_s3 = inlined_call_operand.hbm [shape: f32[16,128], index: 3, kind: output, shape index: {0}, may-alias: {1,3}]   ;;  %s532_s4 = inlined_call_operand.hbm [shape: f32[16,128], index: 4, kind: output, shape index: {1}, may-alias: {2,4}]  }
   0x1   :  { %11 = vsyncpa [#allocation6], 0 }
   0x2   :  { %12 = vsyncpa [#allocation4], 0 }
   0x3   :  { %13 = vsyncpa [#allocation9], 0  ;;  %s358_s15 = smov [#allocation2]   ;;  %s262_s19 = scalar_lea.hbm %s529_s1, 256 }
   0x4   :  { %s21_s16 = sshll.u32 %s358_s15, 4  ;;  %p263_p0 = scmp.ne.s32.totalorder %s529_s1, %s262_s19  ;;  %s22_s16 = int_to_ptr.vmem [resolvable:$true] %s21_s16 }
   0x5   :  { %p266_p1 = scmp.lt.u32.totalorder %s262_s19, %s529_s1 }
   0x7   :  { %p268_p2 = pnand %p266_p1, %p263_p0 }
   0x9   :  { %271 = shalt.err (!%p268_p2)
}
   0xa   :  { %s272_s24 = scalar_lea.vmem %s22_s16, 256  ;;  %p277_p4 = scmp.lt.s32.totalorder %s22_s16, %s22_s16 }
   0xb   :  { %p273_p3 = scmp.ne.s32.totalorder %s22_s16, %s272_s24  ;;  %p278_p5 = scmp.lt.s32.totalorder %s272_s24, %s272_s24 }
   0xd   :  { %p279_p6 = por %p278_p5, %p277_p4 }
   0xf   :  { %p280_p7 = pnand %p279_p6, %p273_p3 }
  0x11   :  { %283 = shalt.err (!%p280_p7)
}
  0x12   :  { %s359_s25 = smov 128   ;;  %s360_s26 = smov 8  }
  0x13   :  { %27 = dma.hbm_to_vmem [thread:$0]  %s529_s1, 256, %s22_s16, [#allocation3], %s359_s25, %s359_s25, %s360_s26  }
  0x14   :  { %s361_s29 = smov [#allocation5]   ;;  %s284_s7 = scalar_lea.hbm %s530_s2, 256 }
  0x15   :  { %s33_s30 = sshll.u32 %s361_s29, 4  ;;  %p285_p8 = scmp.ne.s32.totalorder %s530_s2, %s284_s7  ;;  %s34_s30 = int_to_ptr.vmem [resolvable:$true] %s33_s30 }
  0x16   :  { %p288_p9 = scmp.lt.u32.totalorder %s284_s7, %s530_s2 }
  0x18   :  { %p290_p10 = pnand %p288_p9, %p285_p8 }
  0x1a   :  { %293 = shalt.err (!%p290_p10)
}
  0x1b   :  { %s294_s12 = scalar_lea.vmem %s34_s30, 256  ;;  %p299_p12 = scmp.lt.s32.totalorder %s34_s30, %s34_s30 }
  0x1c   :  { %p295_p11 = scmp.ne.s32.totalorder %s34_s30, %s294_s12  ;;  %p300_p13 = scmp.lt.s32.totalorder %s294_s12, %s294_s12 }
  0x1e   :  { %p301_p0 = por %p300_p13, %p299_p12 }
  0x20   :  { %p302_p1 = pnand %p301_p0, %p295_p11 }
  0x22   :  { %305 = shalt.err (!%p302_p1)
}
  0x23   :  { %39 = dma.hbm_to_vmem [thread:$0]  %s530_s2, 256, %s34_s30, [#allocation6], %s359_s25, %s359_s25, %s360_s26  }
  0x24   :  { %350 = dma.done.wait [#allocation3], 256  }
  0x25   :  { %351 = vsyncadd [#allocation3], 4294967040 }
  0x26   :  { %352 = dma.done.wait [#allocation6], 256  }
  0x27   :  { %353 = vsyncadd [#allocation6], 4294967040  ;;  %v50_v0 = vld [vmem:[#allocation2] sm:$0xff]  ;;  %v51_v1 = vld [vmem:[#allocation2 + $0x8] sm:$0xff]  ;;  %s363_s6 = smov [#allocation7]  }
  0x28   :  { %v218_v2 = vld [vmem:[%s528_s0] sm:$0xff]   ;;  %v66_v3 = vmul.f32 0.95122945, %v50_v0  ;;  %v249_v4 = vld [vmem:[%s528_s0 + $0x8] sm:$0xff]   ;;  %v250_v7 = vld [vmem:[%s528_s0 + $0x10] sm:$0xff]   ;;  %s174_s7 = sshll.u32 %s363_s6, 4  ;;  %s489_s7 = int_to_ptr.vmem [resolvable:$true] %s174_s7 }
  0x29   :  { %v219_v5 = vunpack.c.l.bf16 %v218_v2  ;;  %v223_v6 = vunpack.c.l.bf16 %v249_v4  ;;  %v251_v8 = vld [vmem:[%s528_s0 + $0x18] sm:$0xff]   ;;  %v220_v9 = vunpack.c.h.bf16 %v218_v2  ;;  %v227_v10 = vunpack.c.l.bf16 %v250_v7  ;;  %v252_v16 = vld [vmem:[%s528_s0 + $0x20] sm:$0xff]   ;;  %v54_v18 = vld [vmem:[#allocation5] sm:$0xff] }
  0x2a   :  { %v67_v11 = vmul.f32 0.95122945, %v51_v1  ;;  %v224_v12 = vunpack.c.h.bf16 %v249_v4  ;;  %v231_v15 = vunpack.c.l.bf16 %v251_v8  ;;  %v228_v17 = vunpack.c.h.bf16 %v250_v7  ;;  %v55_v19 = vld [vmem:[#allocation5 + $0x8] sm:$0xff]  ;;  %v253_v23 = vld [vmem:[%s528_s0 + $0x28] sm:$0xff]   ;;  %v254_v27 = vld [vmem:[%s528_s0 + $0x30] sm:$0xff]  }
  0x2b   :  { %vm68_vm0 = vcmp.ne.f32.partialorder %v219_v5, 0.0  ;;  %vm81_vm1 = vcmp.ne.f32.partialorder %v223_v6, 0.0  ;;  %vm69_vm2 = vcmp.ne.f32.partialorder %v220_v9, 0.0  ;;  %vm94_vm3 = vcmp.ne.f32.partialorder %v227_v10, 0.0  ;;  %v255_v44 = vld [vmem:[%s528_s0 + $0x38] sm:$0xff]   ;;  %s362_s0 = smov [#allocation8]  }
  0x2c   :  { %v70_v13 = vsel %vm68_vm0, 1.0, %v66_v3  ;;  %v71_v21 = vsel %vm69_vm2, 1.0, %v67_v11  ;;  %vm82_vm4 = vcmp.ne.f32.partialorder %v224_v12, 0.0  ;;  %vm437_vm5 = vcmp.ne.f32.partialorder %v231_v15, 0.0  ;;  %s186_s5 = sshll.u32 %s362_s0, 4  ;;  %s187_s5 = int_to_ptr.vmem [resolvable:$true] %s186_s5 }
  0x2d   :  { %v79_v14 = vmul.f32 0.95122945, %v70_v13  ;;  %v80_v24 = vmul.f32 0.95122945, %v71_v21  ;;  %v235_v26 = vunpack.c.l.bf16 %v252_v16  ;;  %vm444_vm6 = vcmp.ne.f32.partialorder %v228_v17, 0.0  ;;  %s306_s8 = scalar_lea.vmem %s187_s5, 256  ;;  %p311_p3 = scmp.lt.s32.totalorder %s187_s5, %s187_s5 }
  0x2e   :  { %v232_v29 = vunpack.c.h.bf16 %v251_v8  ;;  %v72_v32 = vadd.f32 %v219_v5, %v54_v18  ;;  %v73_v33 = vadd.f32 %v220_v9, %v55_v19  ;;  %v239_v35 = vunpack.c.l.bf16 %v253_v23  ;;  %p307_p2 = scmp.ne.s32.totalorder %s187_s5, %s306_s8  ;;  %p312_p4 = scmp.lt.s32.totalorder %s306_s8, %s306_s8 }
  0x2f   :  { %v83_v20 = vsel %vm81_vm1, 1.0, %v79_v14  ;;  %v84_v31 = vsel %vm82_vm4, 1.0, %v80_v24  ;;  %v236_v37 = vunpack.c.h.bf16 %v252_v16  ;;  %v243_v38 = vunpack.c.l.bf16 %v254_v27 }
  0x30   :  { %v92_v22 = vmul.f32 0.95122945, %v83_v20  ;;  %v93_v36 = vmul.f32 0.95122945, %v84_v31  ;;  %v85_v39 = vadd.f32 %v223_v6, %v72_v32  ;;  %v86_v40 = vadd.f32 %v224_v12, %v73_v33  ;;  %p313_p5 = por %p312_p4, %p311_p3 }
  0x31   :  { %vm120_vm7 = vcmp.ne.f32.partialorder %v235_v26, 0.0  ;;  %vm108_vm8 = vcmp.ne.f32.partialorder %v232_v29, 0.0  ;;  %vm455_vm9 = vcmp.ne.f32.partialorder %v239_v35, 0.0  ;;  %vm459_vm10 = vcmp.ne.f32.partialorder %v236_v37, 0.0 }
  0x32   :  { %v96_v30 = vsel %vm94_vm3, 1.0, %v92_v22  ;;  %v97_v42 = vsel %vm444_vm6, 1.0, %v93_v36  ;;  %v98_v46 = vadd.f32 %v227_v10, %v85_v39  ;;  %v99_v47 = vadd.f32 %v228_v17, %v86_v40  ;;  %p314_p6 = pnand %p313_p5, %p307_p2 }
  0x33   :  { %v105_v34 = vmul.f32 0.95122945, %v96_v30  ;;  %v106_v45 = vmul.f32 0.95122945, %v97_v42  ;;  %v240_v50 = vunpack.c.h.bf16 %v253_v23  ;;  %v247_v56 = vunpack.c.l.bf16 %v255_v44 }
  0x34   :  { %v111_v53 = vadd.f32 %v231_v15, %v98_v46  ;;  %v112_v54 = vadd.f32 %v232_v29, %v99_v47  ;;  %v244_v58 = vunpack.c.h.bf16 %v254_v27  ;;  %vm463_vm11 = vcmp.ne.f32.partialorder %v243_v38, 0.0 }
  0x35   :  { %v109_v41 = vsel %vm437_vm5, 1.0, %v105_v34  ;;  %v110_v52 = vsel %vm108_vm8, 1.0, %v106_v45  ;;  %vm134_vm12 = vcmp.ne.f32.partialorder %v240_v50, 0.0  ;;  %v248_v0 = vunpack.c.h.bf16 %v255_v44 }
  0x36   :  { %v118_v43 = vmul.f32 0.95122945, %v109_v41  ;;  %v119_v57 = vmul.f32 0.95122945, %v110_v52  ;;  %v124_v60 = vadd.f32 %v235_v26, %v111_v53  ;;  %v125_v61 = vadd.f32 %v236_v37, %v112_v54 }
  0x37   :  { %vm471_vm13 = vcmp.ne.f32.partialorder %v247_v56, 0.0  ;;  %vm475_vm14 = vcmp.ne.f32.partialorder %v244_v58, 0.0  ;;  %vm485_vm15 = vcmp.ne.f32.partialorder %v248_v0, 0.0 }
  0x38   :  { %v122_v51 = vsel %vm120_vm7, 1.0, %v118_v43  ;;  %v123_v63 = vsel %vm459_vm10, 1.0, %v119_v57  ;;  %v137_v3 = vadd.f32 %v239_v35, %v124_v60  ;;  %v138_v4 = vadd.f32 %v240_v50, %v125_v61 }
  0x39   :  { %v131_v55 = vmul.f32 0.95122945, %v122_v51  ;;  %v132_v2 = vmul.f32 0.95122945, %v123_v63 }
  0x3a   :  { %v150_v9 = vadd.f32 %v243_v38, %v137_v3  ;;  %v151_v10 = vadd.f32 %v244_v58, %v138_v4 }
  0x3b   :  { %v135_v62 = vsel %vm455_vm9, 1.0, %v131_v55  ;;  %v136_v8 = vsel %vm134_vm12, 1.0, %v132_v2 }
  0x3c   :  { %v144_v1 = vmul.f32 0.95122945, %v135_v62  ;;  %v145_v12 = vmul.f32 0.95122945, %v136_v8  ;;  %v163_v13 = vadd.f32 %v247_v56, %v150_v9  ;;  %v164_v14 = vadd.f32 %v248_v0, %v151_v10 }
  0x3e   :  { %v148_v7 = vsel %vm463_vm11, 1.0, %v144_v1  ;;  %v149_v16 = vsel %vm475_vm14, 1.0, %v145_v12  ;;  %167 = vst [vmem:[#allocation8] sm:$0xff] %v163_v13  ;;  %168 = vst [vmem:[#allocation8 + $0x8] sm:$0xff] %v164_v14 }
  0x3f   :  { %v157_v11 = vmul.f32 0.95122945, %v148_v7  ;;  %v158_v18 = vmul.f32 0.95122945, %v149_v16 }
  0x41   :  { %v161_v15 = vsel %vm471_vm13, 1.0, %v157_v11 }
  0x42   :  { %165 = vst [vmem:[#allocation7] sm:$0xff] %v161_v15 }
  0x43   :  { %317 = shalt.err (!%p314_p6)
}
  0x44   :  { %s318_s11 = scalar_lea.hbm %s532_s4, 256 }
  0x45   :  { %p319_p7 = scmp.ne.s32.totalorder %s532_s4, %s318_s11  ;;  %p322_p8 = scmp.lt.u32.totalorder %s318_s11, %s532_s4 }
  0x47   :  { %p324_p9 = pnand %p322_p8, %p319_p7 }
  0x49   :  { %327 = shalt.err (!%p324_p9)
}
  0x4a   :  { %192 = dma.vmem_to_hbm [thread:$0]  %s187_s5, 256, %s532_s4, [#allocation9], %s359_s25, %s359_s25, %s360_s26   ;;  %v162_v19 = vsel %vm485_vm15, 1.0, %v158_v18 }
  0x4b   :  { %166 = vst [vmem:[#allocation7 + $0x8] sm:$0xff] %v162_v19  ;;  %s328_s17 = scalar_lea.vmem %s489_s7, 256  ;;  %p333_p11 = scmp.lt.s32.totalorder %s489_s7, %s489_s7 }
  0x4c   :  { %p329_p10 = scmp.ne.s32.totalorder %s489_s7, %s328_s17  ;;  %p334_p12 = scmp.lt.s32.totalorder %s328_s17, %s328_s17 }
  0x4e   :  { %p335_p13 = por %p334_p12, %p333_p11 }
  0x50   :  { %p336_p0 = pnand %p335_p13, %p329_p10 }
  0x52   :  { %339 = shalt.err (!%p336_p0)
}
  0x53   :  { %s340_s2 = scalar_lea.hbm %s531_s3, 256 }
  0x54   :  { %p341_p1 = scmp.ne.s32.totalorder %s531_s3, %s340_s2  ;;  %p344_p2 = scmp.lt.u32.totalorder %s340_s2, %s531_s3 }
  0x56   :  { %p346_p3 = pnand %p344_p2, %p341_p1 }
  0x58   :  { %349 = shalt.err (!%p346_p3)
}
  0x59   :  { %180 = dma.vmem_to_hbm [thread:$0]  %s489_s7, 256, %s531_s3, [#allocation4], %s359_s25, %s359_s25, %s360_s26  }
  0x5a   :  { %354 = dma.done.wait [#allocation4], 256  }
  0x5b   :  { %355 = vsyncadd [#allocation4], 4294967040 }
  0x5c   :  { %356 = dma.done.wait [#allocation9], 256  }
  0x5d   :  { %357 = vsyncadd [#allocation9], 4294967040 }
  0x5e   :  { %199 = vsyncpa [#allocation3], 1 }
  0x5f   :  { %200 = vsyncpa [#allocation6], 1 }
  0x60   :  { %201 = vsyncpa [#allocation4], 1 }
  0x61   :  { %202 = vsyncpa [#allocation9], 1 }

</bundles_post_ra>
